<compile_context>
chip_gen: v7x
topology: tpu7x:2x2x1
jax: 0.10.0
libtpu: 0.0.40
codegen_flags: <defaults>
</compile_context>

<pallas_src>
import jax
import jax.numpy as jnp
from jax.experimental import pallas as pl
from jax.experimental.pallas import tpu as pltpu

NEG_SLOPE = 0.01  # F.leaky_relu default negative_slope


def _disc_kernel(x_ref, y_ref, w1x_ref, w1y_ref, b1_ref, w2_ref, b2_ref, out_ref):
    # Layer 1: concat(x, y) @ W1.T  ==  x @ W1x + y @ W1y  (both accumulate on MXU).
    h = jnp.dot(x_ref[...], w1x_ref[...], preferred_element_type=jnp.float32)
    h = h + jnp.dot(y_ref[...], w1y_ref[...], preferred_element_type=jnp.float32)
    h = h + b1_ref[...]                       # (1, H) broadcast bias
    h = jnp.maximum(h, NEG_SLOPE * h)         # leaky_relu epilogue

    # Layer 2 (n_classes == 1): VPU multiply + lane reduction, not a 1-wide matmul.
    score = jnp.sum(h * w2_ref[...], axis=-1, keepdims=True) + b2_ref[...]   # (TB, 1)
    out_ref[...] = score.astype(out_ref.dtype)


def _round_up(n, m):
    return ((n + m - 1) // m) * m


def disc_forward(x, y, params, *, block_b=128):
    """x: (B, x_dim), y: (B, y_dim).
    params = (W1, b1, W2, b2) in PyTorch layout:
       W1: (hidden, x_dim + y_dim), b1: (hidden,), W2: (1, hidden), b2: (1,)."""
    W1, b1, W2, b2 = params
    B, x_dim = x.shape
    _, y_dim = y.shape
    H = W1.shape[0]

    # Host-side weight re-layout (done once): split the concat dimension.
    w1x = jnp.transpose(W1[:, :x_dim]).astype(jnp.float32)   # (x_dim, H)
    w1y = jnp.transpose(W1[:, x_dim:]).astype(jnp.float32)   # (y_dim, H)
    b1r = b1.reshape(1, H).astype(jnp.float32)
    w2r = W2.reshape(1, H).astype(jnp.float32)
    b2r = b2.reshape(1, 1).astype(jnp.float32)

    # Batch tiling: every block sublane-aligned (multiple of 8 rows).
    tb = block_b if B >= block_b else _round_up(B, 8)
    Bp = _round_up(B, tb)
    if Bp != B:
        pad = Bp - B
        x = jnp.concatenate([x, jnp.zeros((pad, x_dim), x.dtype)], axis=0)
        y = jnp.concatenate([y, jnp.zeros((pad, y_dim), y.dtype)], axis=0)

    grid = (Bp // tb,)

    out = pl.pallas_call(
        _disc_kernel,
        out_shape=jax.ShapeDtypeStruct((Bp, 1), jnp.float32),
        grid=grid,
        in_specs=[
            pl.BlockSpec((tb, x_dim), lambda i: (i, 0)),    # x batch tile
            pl.BlockSpec((tb, y_dim), lambda i: (i, 0)),    # y batch tile
            pl.BlockSpec((x_dim, H), lambda i: (0, 0)),     # W1x (resident)
            pl.BlockSpec((y_dim, H), lambda i: (0, 0)),     # W1y (resident)
            pl.BlockSpec((1, H), lambda i: (0, 0)),         # b1
            pl.BlockSpec((1, H), lambda i: (0, 0)),         # W2 row
            pl.BlockSpec((1, 1), lambda i: (0, 0)),         # b2
        ],
        out_specs=pl.BlockSpec((tb, 1), lambda i: (i, 0)),
        compiler_params=pltpu.CompilerParams(
            dimension_semantics=("parallel",)),              # megacore sharding on v7x
    )(x, y, w1x, w1y, b1r, w2r, b2r)

    return out[:B, 0]                                        # squeeze(-1)


def disc_ref(x, y, params):
    """Plain-JAX reference (identical semantics to the PyTorch eval-mode forward)."""
    W1, b1, W2, b2 = params
    inp = jnp.concatenate([x, y], axis=-1)
    h = inp @ W1.T + b1
    h = jnp.where(h > 0, h, NEG_SLOPE * h)
    out = h @ W2.T + b2
    return out[:, 0]


if __name__ == "__main__":
    key = jax.random.PRNGKey(0)
    k = jax.random.split(key, 6)

    # Disc(x_dim=32, y_dim=32) -> MLP(in_dim=64, n_classes=1, hidden_dim=32, n_layers=2)
    B, x_dim, y_dim = 2, 32, 32
    H = y_dim

    x = jax.random.normal(k[0], (B, x_dim), jnp.float32)
    y = jax.random.normal(k[1], (B, y_dim), jnp.float32)
    W1 = 0.1 * jax.random.normal(k[2], (H, x_dim + y_dim), jnp.float32)
    b1 = 0.1 * jax.random.normal(k[3], (H,), jnp.float32)
    W2 = 0.1 * jax.random.normal(k[4], (1, H), jnp.float32)
    b2 = 0.1 * jax.random.normal(k[5], (1,), jnp.float32)
    params = (W1, b1, W2, b2)

    out = disc_forward(x, y, params)
    jax.block_until_ready(out)
    ref = disc_ref(x, y, params)
    assert out.shape == (B,), out.shape
    assert jnp.allclose(out, ref, atol=1e-5, rtol=1e-5), float(jnp.max(jnp.abs(out - ref)))

    # Also exercise the batch grid + padding path (grid > 1, B not a tile multiple).
    B2 = 260
    x2 = jax.random.normal(k[0], (B2, x_dim), jnp.float32)
    y2 = jax.random.normal(k[1], (B2, y_dim), jnp.float32)
    out2 = disc_forward(x2, y2, params)
    jax.block_until_ready(out2)
    ref2 = disc_ref(x2, y2, params)
    assert out2.shape == (B2,), out2.shape
    assert jnp.allclose(out2, ref2, atol=1e-5, rtol=1e-5), float(jnp.max(jnp.abs(out2 - ref2)))

    print("KERNEL_OK")
</pallas_src>

<mosaic_0001>
module attributes {stable_mosaic.version = 11 : i64} {
  func.func @_disc_kernel(%arg0: i32, %arg1: memref<8x32xf32, #tpu.memory_space<vmem>>, %arg2: memref<8x32xf32, #tpu.memory_space<vmem>>, %arg3: memref<32x32xf32, #tpu.memory_space<vmem>>, %arg4: memref<32x32xf32, #tpu.memory_space<vmem>>, %arg5: memref<1x32xf32, #tpu.memory_space<vmem>>, %arg6: memref<1x32xf32, #tpu.memory_space<vmem>>, %arg7: memref<1x1xf32, #tpu.memory_space<vmem>>, %arg8: memref<8x1xf32, #tpu.memory_space<vmem>>) attributes {dimension_semantics = [#tpu.dimension_semantics<parallel>], iteration_bounds = array<i64: 1>, scalar_prefetch = 0 : i64, scratch_operands = 0 : i64, tpu.core_type = #tpu.core_type<tc>, window_params = [{transform_indices = @transform_0, window_bounds = array<i64: 8, 32>}, {transform_indices = @transform_1, window_bounds = array<i64: 8, 32>}, {pipeline_mode = #tpu.pipeline_mode<synchronous>, transform_indices = @transform_2, window_bounds = array<i64: 32, 32>}, {pipeline_mode = #tpu.pipeline_mode<synchronous>, transform_indices = @transform_3, window_bounds = array<i64: 32, 32>}, {pipeline_mode = #tpu.pipeline_mode<synchronous>, transform_indices = @transform_4, window_bounds = array<i64: 1, 32>}, {pipeline_mode = #tpu.pipeline_mode<synchronous>, transform_indices = @transform_5, window_bounds = array<i64: 1, 32>}, {pipeline_mode = #tpu.pipeline_mode<synchronous>, transform_indices = @transform_6, window_bounds = array<i64: 1, 1>}, {transform_indices = @transform_7, window_bounds = array<i64: 8, 1>}]} {
    %c0 = arith.constant 0 : index
    %c0_0 = arith.constant 0 : index
    %0 = vector.load %arg1[%c0, %c0_0] : memref<8x32xf32, #tpu.memory_space<vmem>>, vector<8x32xf32>
    %c0_1 = arith.constant 0 : index
    %c0_2 = arith.constant 0 : index
    %1 = vector.load %arg3[%c0_1, %c0_2] : memref<32x32xf32, #tpu.memory_space<vmem>>, vector<32x32xf32>
    %cst = arith.constant dense<0.000000e+00> : vector<8x32xf32>
    %2 = tpu.matmul %0, %1, %cst {dimension_numbers = #tpu.dot_dimension_numbers<[1], [0], [0], [1], [0, 0, 1, 1], [], []>} : vector<8x32xf32>, vector<32x32xf32>, vector<8x32xf32> -> vector<8x32xf32>
    %c0_3 = arith.constant 0 : index
    %c0_4 = arith.constant 0 : index
    %3 = vector.load %arg2[%c0_3, %c0_4] : memref<8x32xf32, #tpu.memory_space<vmem>>, vector<8x32xf32>
    %c0_5 = arith.constant 0 : index
    %c0_6 = arith.constant 0 : index
    %4 = vector.load %arg4[%c0_5, %c0_6] : memref<32x32xf32, #tpu.memory_space<vmem>>, vector<32x32xf32>
    %cst_7 = arith.constant dense<0.000000e+00> : vector<8x32xf32>
    %5 = tpu.matmul %3, %4, %cst_7 {dimension_numbers = #tpu.dot_dimension_numbers<[1], [0], [0], [1], [0, 0, 1, 1], [], []>} : vector<8x32xf32>, vector<32x32xf32>, vector<8x32xf32> -> vector<8x32xf32>
    %6 = arith.addf %2, %5 : vector<8x32xf32>
    %c0_8 = arith.constant 0 : index
    %c0_9 = arith.constant 0 : index
    %7 = vector.load %arg5[%c0_8, %c0_9] : memref<1x32xf32, #tpu.memory_space<vmem>>, vector<1x32xf32>
    %8 = vector.broadcast %7 : vector<1x32xf32> to vector<8x32xf32>
    %9 = arith.addf %6, %8 : vector<8x32xf32>
    %cst_10 = arith.constant 0.00999999977 : f32
    %10 = vector.broadcast %cst_10 : f32 to vector<8x32xf32>
    %11 = arith.mulf %10, %9 : vector<8x32xf32>
    %12 = arith.maximumf %9, %11 : vector<8x32xf32>
    %c0_11 = arith.constant 0 : index
    %c0_12 = arith.constant 0 : index
    %13 = vector.load %arg6[%c0_11, %c0_12] : memref<1x32xf32, #tpu.memory_space<vmem>>, vector<1x32xf32>
    %14 = vector.broadcast %13 : vector<1x32xf32> to vector<8x32xf32>
    %15 = arith.mulf %12, %14 : vector<8x32xf32>
    %cst_13 = arith.constant dense<0.000000e+00> : vector<8xf32>
    %16 = vector.multi_reduction <add>, %15, %cst_13 [1] : vector<8x32xf32> to vector<8xf32>
    %17 = vector.shape_cast %16 : vector<8xf32> to vector<8x1xf32>
    %c0_14 = arith.constant 0 : index
    %c0_15 = arith.constant 0 : index
    %18 = vector.load %arg7[%c0_14, %c0_15] : memref<1x1xf32, #tpu.memory_space<vmem>>, vector<1x1xf32>
    %19 = vector.broadcast %18 : vector<1x1xf32> to vector<8x1xf32>
    %20 = arith.addf %17, %19 : vector<8x1xf32>
    %c0_16 = arith.constant 0 : index
    %c0_17 = arith.constant 0 : index
    %21 = vector.load %arg8[%c0_16, %c0_17] : memref<8x1xf32, #tpu.memory_space<vmem>>, vector<8x1xf32>
    tpu.vector_store %arg8[%c0_16, %c0_17], %20 {strides = array<i32>} : memref<8x1xf32, #tpu.memory_space<vmem>>, vector<8x1xf32>,
    return
  }
  func.func @transform_0(%arg0: i32) -> (i32, i32) {
    %c0_i32 = arith.constant 0 : i32
    %c0_i32_0 = arith.constant 0 : i32
    return %arg0, %c0_i32 : i32, i32
  }
  func.func @transform_1(%arg0: i32) -> (i32, i32) {
    %c0_i32 = arith.constant 0 : i32
    %c0_i32_0 = arith.constant 0 : i32
    return %arg0, %c0_i32 : i32, i32
  }
  func.func @transform_2(%arg0: i32) -> (i32, i32) {
    %c0_i32 = arith.constant 0 : i32
    %c0_i32_0 = arith.constant 0 : i32
    %c0_i32_1 = arith.constant 0 : i32
    return %c0_i32, %c0_i32_0 : i32, i32
  }
  func.func @transform_3(%arg0: i32) -> (i32, i32) {
    %c0_i32 = arith.constant 0 : i32
    %c0_i32_0 = arith.constant 0 : i32
    %c0_i32_1 = arith.constant 0 : i32
    return %c0_i32, %c0_i32_0 : i32, i32
  }
  func.func @transform_4(%arg0: i32) -> (i32, i32) {
    %c0_i32 = arith.constant 0 : i32
    %c0_i32_0 = arith.constant 0 : i32
    %c0_i32_1 = arith.constant 0 : i32
    return %c0_i32, %c0_i32_0 : i32, i32
  }
  func.func @transform_5(%arg0: i32) -> (i32, i32) {
    %c0_i32 = arith.constant 0 : i32
    %c0_i32_0 = arith.constant 0 : i32
    %c0_i32_1 = arith.constant 0 : i32
    return %c0_i32, %c0_i32_0 : i32, i32
  }
  func.func @transform_6(%arg0: i32) -> (i32, i32) {
    %c0_i32 = arith.constant 0 : i32
    %c0_i32_0 = arith.constant 0 : i32
    %c0_i32_1 = arith.constant 0 : i32
    return %c0_i32, %c0_i32_0 : i32, i32
  }
  func.func @transform_7(%arg0: i32) -> (i32, i32) {
    %c0_i32 = arith.constant 0 : i32
    %c0_i32_0 = arith.constant 0 : i32
    return %arg0, %c0_i32 : i32, i32
  }
}

</mosaic_0001>

<bundles_post_ra>
// kernel: tpu_custom_call.1
= control target key start
LH: loop header
LB: loop body
LE: loop exit
PB: predicated region body
PF: predicated region fallthrough
CT: control target
= control target key end

     0   :  { %s538_s0 = inlined_call_operand.hbm [shape: f32[8,32], index: 0, kind: input, shape index: {}]   ;;  %s539_s1 = inlined_call_operand.hbm [shape: f32[8,32], index: 1, kind: input, shape index: {}]   ;;  %s540_s2 = inlined_call_operand.hbm [shape: f32[32,32], index: 2, kind: input, shape index: {}]   ;;  %s541_s3 = inlined_call_operand.hbm [shape: f32[32,32], index: 3, kind: input, shape index: {}]   ;;  %s542_s4 = inlined_call_operand.vmem [shape: f32[1,32], index: 4, kind: input, shape index: {}]   ;;  %s543_s5 = inlined_call_operand.vmem [shape: f32[1,32], index: 5, kind: input, shape index: {}]   ;;  %s544_s6 = inlined_call_operand.<no memory space> [shape: f32[1,1], index: 6, kind: input, shape index: {}]   ;;  %s545_s7 = inlined_call_operand.vmem [shape: f32[8,1], index: 7, kind: output, shape index: {}]  }
   0x1   :  { %v12_v0 = vstv %s544_s6 }
   0x2   :  { %13 = vst [vmem:[#allocation2] sm:$0x1] %v12_v0 }
   0x3   :  { %14 = vsyncpa [#allocation4], 0 }
   0x4   :  { %15 = vsyncpa [#allocation6], 0 }
   0x5   :  { %16 = vsyncpa [#allocation9], 0  ;;  %s426_s26 = smov [#allocation5]   ;;  %s427_s28 = smov [#allocation3]  }
   0x6   :  { %s33_s27 = sshll.u32 %s426_s26, 4  ;;  %s23_s29 = sshll.u32 %s427_s28, 4  ;;  %s34_s27 = int_to_ptr.vmem [resolvable:$true] %s33_s27  ;;  %s24_s29 = int_to_ptr.vmem [resolvable:$true] %s23_s29 }
   0x7   :  { %s332_s9 = scalar_lea.hbm %s539_s1, 128 }
   0x8   :  { %p333_p0 = scmp.ne.s32.totalorder %s539_s1, %s332_s9  ;;  %p336_p1 = scmp.lt.u32.totalorder %s332_s9, %s539_s1 }
   0xa   :  { %p338_p2 = pnand %p336_p1, %p333_p0 }
   0xc   :  { %341 = shalt.err (!%p338_p2)
}
   0xd   :  { %s342_s13 = scalar_lea.vmem %s34_s27, 128  ;;  %p347_p4 = scmp.lt.s32.totalorder %s34_s27, %s34_s27 }
   0xe   :  { %p343_p3 = scmp.ne.s32.totalorder %s34_s27, %s342_s13  ;;  %p348_p5 = scmp.lt.s32.totalorder %s342_s13, %s342_s13 }
  0x10   :  { %p349_p6 = por %p348_p5, %p347_p4 }
  0x12   :  { %p350_p7 = pnand %p349_p6, %p343_p3 }
  0x14   :  { %353 = shalt.err (!%p350_p7)
}
  0x15   :  { %36 = dma.hbm_to_vmem [thread:$0]  %s539_s1, 128, %s34_s27, [#allocation6]  }
  0x16   :  { %s354_s18 = scalar_lea.hbm %s538_s0, 128 }
  0x17   :  { %p355_p8 = scmp.ne.s32.totalorder %s538_s0, %s354_s18  ;;  %p358_p9 = scmp.lt.u32.totalorder %s354_s18, %s538_s0 }
  0x19   :  { %p360_p10 = pnand %p358_p9, %p355_p8 }
  0x1b   :  { %363 = shalt.err (!%p360_p10)
}
  0x1c   :  { %s364_s23 = scalar_lea.vmem %s24_s29, 128  ;;  %p369_p12 = scmp.lt.s32.totalorder %s24_s29, %s24_s29 }
  0x1d   :  { %p365_p11 = scmp.ne.s32.totalorder %s24_s29, %s364_s23  ;;  %p370_p13 = scmp.lt.s32.totalorder %s364_s23, %s364_s23 }
  0x1f   :  { %p371_p0 = por %p370_p13, %p369_p12 }
  0x21   :  { %p372_p1 = pnand %p371_p0, %p365_p11 }
  0x23   :  { %375 = shalt.err (!%p372_p1)
}
  0x24   :  { %26 = dma.hbm_to_vmem [thread:$0]  %s538_s0, 128, %s24_s29, [#allocation4]  }
  0x25   :  { %s428_s25 = smov [#allocation7]   ;;  %s376_s30 = scalar_lea.hbm %s540_s2, 512 }
  0x26   :  { %s42_s26 = sshll.u32 %s428_s25, 4  ;;  %p377_p2 = scmp.ne.s32.totalorder %s540_s2, %s376_s30  ;;  %s43_s26 = int_to_ptr.vmem [resolvable:$true] %s42_s26 }
  0x27   :  { %p380_p3 = scmp.lt.u32.totalorder %s376_s30, %s540_s2 }
  0x29   :  { %p382_p4 = pnand %p380_p3, %p377_p2 }
  0x2b   :  { %385 = shalt.err (!%p382_p4)
}
  0x2c   :  { %s386_s12 = scalar_lea.vmem %s43_s26, 512  ;;  %p391_p6 = scmp.lt.s32.totalorder %s43_s26, %s43_s26 }
  0x2d   :  { %p387_p5 = scmp.ne.s32.totalorder %s43_s26, %s386_s12  ;;  %p392_p7 = scmp.lt.s32.totalorder %s386_s12, %s386_s12 }
  0x2f   :  { %p393_p8 = por %p392_p7, %p391_p6 }
  0x31   :  { %p394_p9 = pnand %p393_p8, %p387_p5 }
  0x33   :  { %397 = shalt.err (!%p394_p9)
}
  0x34   :  { %s429_s0 = smov 128   ;;  %s430_s29 = smov 8  }
  0x35   :  { %48 = dma.hbm_to_vmem [thread:$0]  %s540_s2, 512, %s43_s26, [#allocation6], %s429_s0, %s429_s0, %s430_s29  }
  0x36   :  { %s431_s14 = smov [#allocation8]   ;;  %s398_s18 = scalar_lea.hbm %s541_s3, 512 }
  0x37   :  { %s54_s15 = sshll.u32 %s431_s14, 4  ;;  %p399_p10 = scmp.ne.s32.totalorder %s541_s3, %s398_s18  ;;  %s55_s15 = int_to_ptr.vmem [resolvable:$true] %s54_s15 }
  0x38   :  { %p402_p11 = scmp.lt.u32.totalorder %s398_s18, %s541_s3 }
  0x3a   :  { %p404_p12 = pnand %p402_p11, %p399_p10 }
  0x3c   :  { %407 = shalt.err (!%p404_p12)
}
  0x3d   :  { %s408_s23 = scalar_lea.vmem %s55_s15, 512  ;;  %p413_p0 = scmp.lt.s32.totalorder %s55_s15, %s55_s15 }
  0x3e   :  { %p409_p13 = scmp.ne.s32.totalorder %s55_s15, %s408_s23  ;;  %p414_p1 = scmp.lt.s32.totalorder %s408_s23, %s408_s23 }
  0x40   :  { %p415_p2 = por %p414_p1, %p413_p0 }
  0x42   :  { %p416_p3 = pnand %p415_p2, %p409_p13 }
  0x44   :  { %419 = shalt.err (!%p416_p3)
}
  0x45   :  { %60 = dma.hbm_to_vmem [thread:$0]  %s541_s3, 512, %s55_s15, [#allocation9], %s429_s0, %s429_s0, %s430_s29  }
  0x46   :  { %420 = dma.done.wait [#allocation4], 128  }
  0x47   :  { %421 = vsyncadd [#allocation4], 4294967168 }
  0x48   :  { %422 = dma.done.wait [#allocation6], 640  }
  0x49   :  { %423 = vsyncadd [#allocation6], 4294966656 }
  0x4a   :  { %424 = dma.done.wait [#allocation9], 512  }
  0x4b   :  { %425 = vsyncadd [#allocation9], 4294966784  ;;  %v432_v1 = vmov 0.0|0.0   ;;  %vm433_vm0 = vmmov 0   ;;  %v434_v2 = vmov 0.0   ;;  %v85_v3 = vld [vmem:[#allocation8] sm:$0xff] }
  0x4c   :  { %311 = vmatprep.subr.bf16.mxu0 %v432_v1  ;;  %317 = vmatprep.subr.bf16.mxu1 %v432_v1  ;;  %v86_v4 = vld [vmem:[#allocation8 + $0x8] sm:$0xff]  ;;  %v80_v5 = vld [vmem:[#allocation7] sm:$0xff]  ;;  %v87_v8 = vld [vmem:[#allocation8 + $0x10] sm:$0xff]  ;;  %vm89_vm1 = vcmask 261120   ;;  %vm265_vm2 = vcmask 7168  }
  0x4d   :  { %297 = vmatprep.mubr.msk.f32.mxu0 %vm433_vm0, %v434_v2  ;;  %308 = vmatprep.mubr.msk.f32.mxu1 %vm433_vm0, %v434_v2  ;;  %v312_v6 = vpack.c.bf16 %v86_v4, %v85_v3  ;;  %v81_v7 = vld [vmem:[#allocation7 + $0x8] sm:$0xff]  ;;  %v88_v9 = vld [vmem:[#allocation8 + $0x18] sm:$0xff]  ;;  %v82_v11 = vld [vmem:[#allocation7 + $0x10] sm:$0xff] }
  0x4e   :  { %v318_v10 = vpack.c.bf16 %v81_v7, %v80_v5  ;;  %v83_v12 = vld [vmem:[#allocation7 + $0x18] sm:$0xff]  ;;  %v315_v13 = vpack.c.bf16 %v88_v9, %v87_v8  ;;  %v79_v16 = vld [vmem:[#allocation3] sm:$0xff]  ;;  %v276_v19 = vld [vmem:[%s542_s4] ss:$0 sm:$0xff] }
  0x4f   :  { %313 = vmatpush3.bf16.msra.mxu0 %v312_v6  ;;  %v321_v14 = vpack.c.bf16 %v83_v12, %v82_v11  ;;  %v84_v15 = vld [vmem:[#allocation5] sm:$0xff]  ;;  %v277_v25 = vld [vmem:[%s543_s5] ss:$0 sm:$0xff] }
  0x50   :  { %319 = vmatpush3.bf16.msra.mxu1 %v318_v10  ;;  %314 = vmatprep.subr.bf16.mxu0 %v432_v1  ;;  %v278_v29 = vld [vmem:[#allocation2] ss:$0 sm:$0xff] }
  0x51   :  { %320 = vmatprep.subr.bf16.mxu1 %v432_v1 }
  0x53   :  { %316 = vmatpush3.bf16.msra.mxu0 %v315_v13 }
  0x54   :  { %322 = vmatpush3.bf16.msra.mxu1 %v321_v14 }
  0x56   :  { %298 = vmatmul.mubr.msk.f32.vlgmr.msra.gmra.mrb[0].mxu0 %vm89_vm1, %v84_v15 }
  0x57   :  { %309 = vmatmul.mubr.msk.f32.vlgmr.msra.gmra.mrb[0].mxu1 %vm89_vm1, %v79_v16 }
 0x129   :  { %v159_v17 = vpop.f32.mrb[0].mxu0 }
 0x12a   :  { %v232_v18 = vpop.f32.mrb[0].mxu1  ;;  %v299_v20 = vpop.f32.mrb[1].mxu0 }
 0x12b   :  { %v233_v21 = vadd.f32 %v232_v18, %v159_v17  ;;  %v310_v22 = vpop.f32.mrb[1].mxu1 }
 0x12d   :  { %v243_v23 = vadd.f32 %v276_v19, %v233_v21 }
 0x12f   :  { %v244_v24 = vmul.f32 0.01, %v243_v23 }
 0x131   :  { %v245_v26 = vmax.f32 %v243_v23, %v244_v24 }
 0x133   :  { %v253_v27 = vmul.f32 %v277_v25, %v245_v26 }
 0x135   :  { %v254_v28 = vsel %vm89_vm1, %v253_v27, 0.0 }
 0x136   :  { %255 = vadd.xlane.f32.xlu0 %v254_v28 }
 0x1c3   :  { %v256_v30 = vpop.xlane.xlu0 %255 }
 0x1c4   :  { %v264_v31 = vadd.f32 %v278_v29, %v256_v30 }
 0x1c6   :  { %266 = vst.msk [vmem:[%s545_s7] sm:$0xff] %vm265_vm2, %v264_v31 }
 0x1c7   :  { %271 = vsyncpa [#allocation4], 1 }
 0x1c8   :  { %272 = vsyncpa [#allocation6], 1 }
 0x1c9   :  { %273 = vsyncpa [#allocation9], 1 }

</bundles_post_ra>
